<compile_context>
chip_gen: v7x
topology: tpu7x:2x2x1
jax: 0.10.0
libtpu: 0.0.40
codegen_flags: <defaults>
</compile_context>

<pallas_src>
import functools

import jax
import jax.numpy as jnp
from jax import lax
from jax.experimental import pallas as pl
from jax.experimental.pallas import tpu as pltpu

NEG_SLOPE = 0.2      # PyG GATConv default leaky-relu negative slope
OUT_PAD = 128        # lane-dense output width (sliced back in the wrapper)


def _gat_net_kernel(x_ref, adj_ref,
                    w1_ref, att1_ref, b1_ref,
                    w2_ref, att2_ref, b2_ref,
                    out_ref, *, heads, hidden, classes):
    n = adj_ref.shape[0]

    x = x_ref[...]                                   # (N, F)
    adj = adj_ref[...]                               # (N, N), adj[dst, src]

    # Hoisted additive mask, shared by both layers and all heads.
    mask_bias = jnp.where(adj > 0, jnp.float32(0.0), jnp.float32(-1e30))

    # eye(N) built from 2-D iotas, used to reorient per-node columns to rows.
    rows = lax.broadcasted_iota(jnp.int32, (n, n), 0)
    cols = lax.broadcasted_iota(jnp.int32, (n, n), 1)
    eye_n = (rows == cols).astype(jnp.float32)

    def row_orient(col):
        # (N, 1) per-node column -> (1, N) row: out[0, j] = col[j].
        # Mask-and-collapse (VPU mul + sublane reduce) instead of a sub-tile
        # sublane->lane transpose; trivial at this size.
        return jnp.sum(eye_n * col, axis=0, keepdims=True)

    def edge_softmax(alpha_dst, alpha_src):
        # alpha_dst, alpha_src: (N, 1) per-node attention scalars.
        e = alpha_dst + row_orient(alpha_src)        # e[i, j] = a_dst[i] + a_src[j]
        e = jnp.where(e > 0, e, NEG_SLOPE * e)       # leaky relu
        e = e + mask_bias                            # mask non-edges (hoisted)
        m = jnp.max(e, axis=1, keepdims=True)        # softmax over incoming edges
        p = jnp.exp(e - m)
        denom = jnp.sum(p, axis=1, keepdims=True)
        return p * pl.reciprocal(denom, approx=True) # divide on the EUP slot

    # ------------- layer 1: GATConv(F -> hidden, heads) + fused ReLU -------------
    h1 = jnp.dot(x, w1_ref[...], preferred_element_type=jnp.float32)   # (N, H*hidden)
    # All 2*heads per-node attention scalars from ONE small MXU matmul against
    # the packed block-diagonal [att_dst | att_src] matrix.
    alpha1 = jnp.dot(h1, att1_ref[...], preferred_element_type=jnp.float32)  # (N, 2H)
    w2 = w2_ref[...]                                 # (H*hidden, classes)
    b1 = b1_ref[...]                                 # (1, H*hidden)

    # Each head's aggregated output is accumulated straight into the layer-2
    # linear transform: no lane-axis concat of narrow per-head fragments, and
    # the hidden activation never leaves VMEM.
    h2 = jnp.zeros((n, classes), jnp.float32)
    for hd in range(heads):                          # static unrolled loop
        sl = slice(hd * hidden, (hd + 1) * hidden)
        attn = edge_softmax(alpha1[:, hd:hd + 1],
                            alpha1[:, heads + hd:heads + hd + 1])       # (N, N)
        o = jnp.dot(attn, h1[:, sl], preferred_element_type=jnp.float32)  # (N, hidden)
        o = jnp.maximum(o + b1[:, sl], 0.0)          # bias + fused ReLU
        # TODO(synk): F.dropout(training=True) not implemented; inference => identity.
        h2 = h2 + jnp.dot(o, w2[sl, :], preferred_element_type=jnp.float32)

    # ---------- layer 2: GATConv(H*hidden -> classes, 1 head) + log_softmax ----------
    att2 = att2_ref[...]                             # (2, classes): row0=dst, row1=src
    alpha_dst2 = jnp.sum(h2 * att2[0:1, :], axis=1, keepdims=True)      # (N, 1)
    alpha_src2 = jnp.sum(h2 * att2[1:2, :], axis=1, keepdims=True)      # (N, 1)
    attn2 = edge_softmax(alpha_dst2, alpha_src2)                        # (N, N)
    o2 = jnp.dot(attn2, h2, preferred_element_type=jnp.float32) + b2_ref[...]

    mx = jnp.max(o2, axis=1, keepdims=True)          # exact log_softmax over classes
    z = o2 - mx
    logp = z - jnp.log(jnp.sum(jnp.exp(z), axis=1, keepdims=True))      # (N, classes)

    # Lane-dense (N, 128) output block; wrapper slices [:, :classes].
    out_ref[...] = jnp.zeros(out_ref.shape, jnp.float32)
    out_ref[:, :classes] = logp


def init_gat_params(key, f_in, f_out, heads):
    """GATConv params: lin (f_in, heads*f_out), att_src/dst (heads, f_out), bias (heads*f_out,)."""
    k1, k2, k3 = jax.random.split(key, 3)
    w = jax.random.normal(k1, (f_in, heads * f_out), jnp.float32) / jnp.sqrt(f_in)
    att_src = jax.random.normal(k2, (heads, f_out), jnp.float32) / jnp.sqrt(f_out)
    att_dst = jax.random.normal(k3, (heads, f_out), jnp.float32) / jnp.sqrt(f_out)
    bias = jnp.zeros((heads * f_out,), jnp.float32)
    return w, att_src, att_dst, bias


def _pack_att(att_dst, att_src):
    """(heads, f_out) x2 -> block-diagonal (heads*f_out, 2*heads) matrix [dst | src]."""
    heads, f_out = att_dst.shape
    a = jnp.zeros((heads * f_out, 2 * heads), jnp.float32)
    for h in range(heads):
        a = a.at[h * f_out:(h + 1) * f_out, h].set(att_dst[h])
        a = a.at[h * f_out:(h + 1) * f_out, heads + h].set(att_src[h])
    return a


@functools.partial(jax.jit, static_argnames=("heads", "hidden", "classes"))
def gat_net_forward(x, adj, params1, params2, *, heads, hidden, classes):
    """Fused GAT_Net forward: gat1 + ReLU + [dropout=id] + gat2 + log_softmax, one pallas_call."""
    w1, att_src1, att_dst1, b1 = params1
    w2, att_src2, att_dst2, b2 = params2
    n = x.shape[0]
    hc1 = heads * hidden

    att1 = _pack_att(att_dst1, att_src1)             # (H*hidden, 2*heads)
    att2 = jnp.concatenate([att_dst2, att_src2], axis=0)   # (2, classes)

    operands = (
        x, adj,
        w1, att1, b1.reshape(1, hc1),
        w2, att2, b2.reshape(1, classes),
    )

    kernel = functools.partial(_gat_net_kernel, heads=heads, hidden=hidden,
                               classes=classes)
    vmem = pl.BlockSpec(memory_space=pltpu.MemorySpace.VMEM)   # whole-array residency

    out_padded = pl.pallas_call(
        kernel,
        out_shape=jax.ShapeDtypeStruct((n, OUT_PAD), jnp.float32),
        in_specs=[vmem] * len(operands),
        out_specs=pl.BlockSpec(memory_space=pltpu.MemorySpace.VMEM),
    )(*operands)
    return out_padded[:, :classes]


if __name__ == "__main__":
    key = jax.random.PRNGKey(0)
    kx, ke1, ke2, kp1, kp2 = jax.random.split(key, 5)

    N, FEATS, HIDDEN, CLASSES, HEADS = 16, 8, 8, 4, 4

    # node features
    x = jax.random.normal(kx, (N, FEATS), jnp.float32)

    # deterministic small graph: a ring plus a handful of random edges
    ring_src = jnp.arange(N, dtype=jnp.int32)
    ring_dst = (ring_src + 1) % N
    extra_src = jax.random.randint(ke1, (24,), 0, N, dtype=jnp.int32)
    extra_dst = jax.random.randint(ke2, (24,), 0, N, dtype=jnp.int32)
    edge_index = jnp.stack([jnp.concatenate([ring_src, extra_src]),
                            jnp.concatenate([ring_dst, extra_dst])])     # (2, E)

    # dense adjacency mask adj[dst, src]; add self loops (PyG GATConv default)
    adj = jnp.zeros((N, N), jnp.float32).at[edge_index[1], edge_index[0]].set(1.0)
    adj = jnp.maximum(adj, jnp.eye(N, dtype=jnp.float32))

    params1 = init_gat_params(kp1, FEATS, HIDDEN, HEADS)          # GATConv(feats, hidden, heads)
    params2 = init_gat_params(kp2, HIDDEN * HEADS, CLASSES, 1)    # GATConv(hidden*heads, classes)

    out = gat_net_forward(x, adj, params1, params2,
                          heads=HEADS, hidden=HIDDEN, classes=CLASSES)
    out = jax.block_until_ready(out)

    # sanity: output is (N, classes) log-probabilities (rows exp-sum to 1)
    assert out.shape == (N, CLASSES)
    assert bool(jnp.all(jnp.isfinite(out)))
    assert bool(jnp.allclose(jnp.exp(out).sum(axis=1), 1.0, atol=1e-4))
    print("KERNEL_OK")
</pallas_src>

<mosaic_0001>
module attributes {stable_mosaic.version = 11 : i64} {
  func.func @_gat_net_kernel(%arg0: memref<16x8xf32, #tpu.memory_space<vmem>>, %arg1: memref<16x16xf32, #tpu.memory_space<vmem>>, %arg2: memref<8x32xf32, #tpu.memory_space<vmem>>, %arg3: memref<32x8xf32, #tpu.memory_space<vmem>>, %arg4: memref<1x32xf32, #tpu.memory_space<vmem>>, %arg5: memref<32x4xf32, #tpu.memory_space<vmem>>, %arg6: memref<2x4xf32, #tpu.memory_space<vmem>>, %arg7: memref<1x4xf32, #tpu.memory_space<vmem>>, %arg8: memref<16x128xf32, #tpu.memory_space<vmem>>) attributes {dimension_semantics = [], scalar_prefetch = 0 : i64, scratch_operands = 0 : i64, tpu.core_type = #tpu.core_type<tc>} {
    %c0 = arith.constant 0 : index
    %c0_0 = arith.constant 0 : index
    %0 = vector.load %arg0[%c0, %c0_0] : memref<16x8xf32, #tpu.memory_space<vmem>>, vector<16x8xf32>
    %c0_1 = arith.constant 0 : index
    %c0_2 = arith.constant 0 : index
    %1 = vector.load %arg1[%c0_1, %c0_2] : memref<16x16xf32, #tpu.memory_space<vmem>>, vector<16x16xf32>
    %cst = arith.constant 0.000000e+00 : f32
    %2 = vector.broadcast %cst : f32 to vector<16x16xf32>
    %3 = arith.cmpf ogt, %1, %2 : vector<16x16xf32>
    %cst_3 = arith.constant 0.000000e+00 : f32
    %cst_4 = arith.constant -1.000000e+30 : f32
    %4 = vector.broadcast %cst_3 : f32 to vector<16x16xf32>
    %5 = vector.broadcast %cst_4 : f32 to vector<16x16xf32>
    %6 = arith.select %3, %4, %5 : vector<16x16xi1>, vector<16x16xf32>
    %7 = tpu.iota {dimensions = array<i32: 0>} : vector<16x16xi32>
    %8 = tpu.iota {dimensions = array<i32: 1>} : vector<16x16xi32>
    %9 = arith.cmpi eq, %7, %8 : vector<16x16xi32>
    %10 = arith.extui %9 : vector<16x16xi1> to vector<16x16xi32>
    %11 = arith.sitofp %10 : vector<16x16xi32> to vector<16x16xf32>
    %c0_5 = arith.constant 0 : index
    %c0_6 = arith.constant 0 : index
    %12 = vector.load %arg2[%c0_5, %c0_6] : memref<8x32xf32, #tpu.memory_space<vmem>>, vector<8x32xf32>
    %cst_7 = arith.constant dense<0.000000e+00> : vector<16x32xf32>
    %13 = tpu.matmul %0, %12, %cst_7 {dimension_numbers = #tpu.dot_dimension_numbers<[1], [0], [0], [1], [0, 0, 1, 1], [], []>} : vector<16x8xf32>, vector<8x32xf32>, vector<16x32xf32> -> vector<16x32xf32>
    %c0_8 = arith.constant 0 : index
    %c0_9 = arith.constant 0 : index
    %14 = vector.load %arg3[%c0_8, %c0_9] : memref<32x8xf32, #tpu.memory_space<vmem>>, vector<32x8xf32>
    %cst_10 = arith.constant dense<0.000000e+00> : vector<16x8xf32>
    %15 = tpu.matmul %13, %14, %cst_10 {dimension_numbers = #tpu.dot_dimension_numbers<[1], [0], [0], [1], [0, 0, 1, 1], [], []>} : vector<16x32xf32>, vector<32x8xf32>, vector<16x8xf32> -> vector<16x8xf32>
    %c0_11 = arith.constant 0 : index
    %c0_12 = arith.constant 0 : index
    %16 = vector.load %arg5[%c0_11, %c0_12] : memref<32x4xf32, #tpu.memory_space<vmem>>, vector<32x4xf32>
    %c0_13 = arith.constant 0 : index
    %c0_14 = arith.constant 0 : index
    %17 = vector.load %arg4[%c0_13, %c0_14] : memref<1x32xf32, #tpu.memory_space<vmem>>, vector<1x32xf32>
    %cst_15 = arith.constant 0.000000e+00 : f32
    %18 = vector.broadcast %cst_15 : f32 to vector<16x4xf32>
    %19 = vector.extract_strided_slice %15 {offsets = [0, 0], sizes = [16, 1], strides = [1, 1]} : vector<16x8xf32> to vector<16x1xf32>
    %20 = vector.extract_strided_slice %15 {offsets = [0, 4], sizes = [16, 1], strides = [1, 1]} : vector<16x8xf32> to vector<16x1xf32>
    %21 = vector.broadcast %20 : vector<16x1xf32> to vector<16x16xf32>
    %22 = arith.mulf %11, %21 : vector<16x16xf32>
    %cst_16 = arith.constant dense<0.000000e+00> : vector<16xf32>
    %23 = vector.multi_reduction <add>, %22, %cst_16 [0] : vector<16x16xf32> to vector<16xf32>
    %24 = vector.shape_cast %23 : vector<16xf32> to vector<1x16xf32>
    %25 = vector.broadcast %19 : vector<16x1xf32> to vector<16x16xf32>
    %26 = vector.broadcast %24 : vector<1x16xf32> to vector<16x16xf32>
    %27 = arith.addf %25, %26 : vector<16x16xf32>
    %cst_17 = arith.constant 0.000000e+00 : f32
    %28 = vector.broadcast %cst_17 : f32 to vector<16x16xf32>
    %29 = arith.cmpf ogt, %27, %28 : vector<16x16xf32>
    %cst_18 = arith.constant 2.000000e-01 : f32
    %30 = vector.broadcast %cst_18 : f32 to vector<16x16xf32>
    %31 = arith.mulf %30, %27 : vector<16x16xf32>
    %32 = arith.select %29, %27, %31 : vector<16x16xi1>, vector<16x16xf32>
    %33 = arith.addf %32, %6 : vector<16x16xf32>
    %cst_19 = arith.constant dense<0xFF800000> : vector<16xf32>
    %34 = vector.multi_reduction <maximumf>, %33, %cst_19 [1] : vector<16x16xf32> to vector<16xf32>
    %35 = vector.shape_cast %34 : vector<16xf32> to vector<16x1xf32>
    %36 = vector.broadcast %35 : vector<16x1xf32> to vector<16x16xf32>
    %37 = arith.subf %33, %36 : vector<16x16xf32>
    %38 = math.exp %37 : vector<16x16xf32>
    %cst_20 = arith.constant dense<0.000000e+00> : vector<16xf32>
    %39 = vector.multi_reduction <add>, %38, %cst_20 [1] : vector<16x16xf32> to vector<16xf32>
    %40 = vector.shape_cast %39 : vector<16xf32> to vector<16x1xf32>
    %41 = tpu.reciprocal %40 {approx = true} : vector<16x1xf32> -> vector<16x1xf32>
    %42 = vector.broadcast %41 : vector<16x1xf32> to vector<16x16xf32>
    %43 = arith.mulf %38, %42 : vector<16x16xf32>
    %44 = vector.extract_strided_slice %13 {offsets = [0, 0], sizes = [16, 8], strides = [1, 1]} : vector<16x32xf32> to vector<16x8xf32>
    %cst_21 = arith.constant dense<0.000000e+00> : vector<16x8xf32>
    %45 = tpu.matmul %43, %44, %cst_21 {dimension_numbers = #tpu.dot_dimension_numbers<[1], [0], [0], [1], [0, 0, 1, 1], [], []>} : vector<16x16xf32>, vector<16x8xf32>, vector<16x8xf32> -> vector<16x8xf32>
    %46 = vector.extract_strided_slice %17 {offsets = [0, 0], sizes = [1, 8], strides = [1, 1]} : vector<1x32xf32> to vector<1x8xf32>
    %47 = vector.broadcast %46 : vector<1x8xf32> to vector<16x8xf32>
    %48 = arith.addf %45, %47 : vector<16x8xf32>
    %cst_22 = arith.constant 0.000000e+00 : f32
    %49 = vector.broadcast %cst_22 : f32 to vector<16x8xf32>
    %50 = arith.maximumf %48, %49 : vector<16x8xf32>
    %51 = vector.extract_strided_slice %16 {offsets = [0, 0], sizes = [8, 4], strides = [1, 1]} : vector<32x4xf32> to vector<8x4xf32>
    %cst_23 = arith.constant dense<0.000000e+00> : vector<16x4xf32>
    %52 = tpu.matmul %50, %51, %cst_23 {dimension_numbers = #tpu.dot_dimension_numbers<[1], [0], [0], [1], [0, 0, 1, 1], [], []>} : vector<16x8xf32>, vector<8x4xf32>, vector<16x4xf32> -> vector<16x4xf32>
    %53 = arith.addf %18, %52 : vector<16x4xf32>
    %54 = vector.extract_strided_slice %15 {offsets = [0, 1], sizes = [16, 1], strides = [1, 1]} : vector<16x8xf32> to vector<16x1xf32>
    %55 = vector.extract_strided_slice %15 {offsets = [0, 5], sizes = [16, 1], strides = [1, 1]} : vector<16x8xf32> to vector<16x1xf32>
    %56 = vector.broadcast %55 : vector<16x1xf32> to vector<16x16xf32>
    %57 = arith.mulf %11, %56 : vector<16x16xf32>
    %cst_24 = arith.constant dense<0.000000e+00> : vector<16xf32>
    %58 = vector.multi_reduction <add>, %57, %cst_24 [0] : vector<16x16xf32> to vector<16xf32>
    %59 = vector.shape_cast %58 : vector<16xf32> to vector<1x16xf32>
    %60 = vector.broadcast %54 : vector<16x1xf32> to vector<16x16xf32>
    %61 = vector.broadcast %59 : vector<1x16xf32> to vector<16x16xf32>
    %62 = arith.addf %60, %61 : vector<16x16xf32>
    %cst_25 = arith.constant 0.000000e+00 : f32
    %63 = vector.broadcast %cst_25 : f32 to vector<16x16xf32>
    %64 = arith.cmpf ogt, %62, %63 : vector<16x16xf32>
    %cst_26 = arith.constant 2.000000e-01 : f32
    %65 = vector.broadcast %cst_26 : f32 to vector<16x16xf32>
    %66 = arith.mulf %65, %62 : vector<16x16xf32>
    %67 = arith.select %64, %62, %66 : vector<16x16xi1>, vector<16x16xf32>
    %68 = arith.addf %67, %6 : vector<16x16xf32>
    %cst_27 = arith.constant dense<0xFF800000> : vector<16xf32>
    %69 = vector.multi_reduction <maximumf>, %68, %cst_27 [1] : vector<16x16xf32> to vector<16xf32>
    %70 = vector.shape_cast %69 : vector<16xf32> to vector<16x1xf32>
    %71 = vector.broadcast %70 : vector<16x1xf32> to vector<16x16xf32>
    %72 = arith.subf %68, %71 : vector<16x16xf32>
    %73 = math.exp %72 : vector<16x16xf32>
    %cst_28 = arith.constant dense<0.000000e+00> : vector<16xf32>
    %74 = vector.multi_reduction <add>, %73, %cst_28 [1] : vector<16x16xf32> to vector<16xf32>
    %75 = vector.shape_cast %74 : vector<16xf32> to vector<16x1xf32>
    %76 = tpu.reciprocal %75 {approx = true} : vector<16x1xf32> -> vector<16x1xf32>
    %77 = vector.broadcast %76 : vector<16x1xf32> to vector<16x16xf32>
    %78 = arith.mulf %73, %77 : vector<16x16xf32>
    %79 = vector.extract_strided_slice %13 {offsets = [0, 8], sizes = [16, 8], strides = [1, 1]} : vector<16x32xf32> to vector<16x8xf32>
    %cst_29 = arith.constant dense<0.000000e+00> : vector<16x8xf32>
    %80 = tpu.matmul %78, %79, %cst_29 {dimension_numbers = #tpu.dot_dimension_numbers<[1], [0], [0], [1], [0, 0, 1, 1], [], []>} : vector<16x16xf32>, vector<16x8xf32>, vector<16x8xf32> -> vector<16x8xf32>
    %81 = vector.extract_strided_slice %17 {offsets = [0, 8], sizes = [1, 8], strides = [1, 1]} : vector<1x32xf32> to vector<1x8xf32>
    %82 = vector.broadcast %81 : vector<1x8xf32> to vector<16x8xf32>
    %83 = arith.addf %80, %82 : vector<16x8xf32>
    %cst_30 = arith.constant 0.000000e+00 : f32
    %84 = vector.broadcast %cst_30 : f32 to vector<16x8xf32>
    %85 = arith.maximumf %83, %84 : vector<16x8xf32>
    %86 = vector.extract_strided_slice %16 {offsets = [8, 0], sizes = [8, 4], strides = [1, 1]} : vector<32x4xf32> to vector<8x4xf32>
    %cst_31 = arith.constant dense<0.000000e+00> : vector<16x4xf32>
    %87 = tpu.matmul %85, %86, %cst_31 {dimension_numbers = #tpu.dot_dimension_numbers<[1], [0], [0], [1], [0, 0, 1, 1], [], []>} : vector<16x8xf32>, vector<8x4xf32>, vector<16x4xf32> -> vector<16x4xf32>
    %88 = arith.addf %53, %87 : vector<16x4xf32>
    %89 = vector.extract_strided_slice %15 {offsets = [0, 2], sizes = [16, 1], strides = [1, 1]} : vector<16x8xf32> to vector<16x1xf32>
    %90 = vector.extract_strided_slice %15 {offsets = [0, 6], sizes = [16, 1], strides = [1, 1]} : vector<16x8xf32> to vector<16x1xf32>
    %91 = vector.broadcast %90 : vector<16x1xf32> to vector<16x16xf32>
    %92 = arith.mulf %11, %91 : vector<16x16xf32>
    %cst_32 = arith.constant dense<0.000000e+00> : vector<16xf32>
    %93 = vector.multi_reduction <add>, %92, %cst_32 [0] : vector<16x16xf32> to vector<16xf32>
    %94 = vector.shape_cast %93 : vector<16xf32> to vector<1x16xf32>
    %95 = vector.broadcast %89 : vector<16x1xf32> to vector<16x16xf32>
    %96 = vector.broadcast %94 : vector<1x16xf32> to vector<16x16xf32>
    %97 = arith.addf %95, %96 : vector<16x16xf32>
    %cst_33 = arith.constant 0.000000e+00 : f32
    %98 = vector.broadcast %cst_33 : f32 to vector<16x16xf32>
    %99 = arith.cmpf ogt, %97, %98 : vector<16x16xf32>
    %cst_34 = arith.constant 2.000000e-01 : f32
    %100 = vector.broadcast %cst_34 : f32 to vector<16x16xf32>
    %101 = arith.mulf %100, %97 : vector<16x16xf32>
    %102 = arith.select %99, %97, %101 : vector<16x16xi1>, vector<16x16xf32>
    %103 = arith.addf %102, %6 : vector<16x16xf32>
    %cst_35 = arith.constant dense<0xFF800000> : vector<16xf32>
    %104 = vector.multi_reduction <maximumf>, %103, %cst_35 [1] : vector<16x16xf32> to vector<16xf32>
    %105 = vector.shape_cast %104 : vector<16xf32> to vector<16x1xf32>
    %106 = vector.broadcast %105 : vector<16x1xf32> to vector<16x16xf32>
    %107 = arith.subf %103, %106 : vector<16x16xf32>
    %108 = math.exp %107 : vector<16x16xf32>
    %cst_36 = arith.constant dense<0.000000e+00> : vector<16xf32>
    %109 = vector.multi_reduction <add>, %108, %cst_36 [1] : vector<16x16xf32> to vector<16xf32>
    %110 = vector.shape_cast %109 : vector<16xf32> to vector<16x1xf32>
    %111 = tpu.reciprocal %110 {approx = true} : vector<16x1xf32> -> vector<16x1xf32>
    %112 = vector.broadcast %111 : vector<16x1xf32> to vector<16x16xf32>
    %113 = arith.mulf %108, %112 : vector<16x16xf32>
    %114 = vector.extract_strided_slice %13 {offsets = [0, 16], sizes = [16, 8], strides = [1, 1]} : vector<16x32xf32> to vector<16x8xf32>
    %cst_37 = arith.constant dense<0.000000e+00> : vector<16x8xf32>
    %115 = tpu.matmul %113, %114, %cst_37 {dimension_numbers = #tpu.dot_dimension_numbers<[1], [0], [0], [1], [0, 0, 1, 1], [], []>} : vector<16x16xf32>, vector<16x8xf32>, vector<16x8xf32> -> vector<16x8xf32>
    %116 = vector.extract_strided_slice %17 {offsets = [0, 16], sizes = [1, 8], strides = [1, 1]} : vector<1x32xf32> to vector<1x8xf32>
    %117 = vector.broadcast %116 : vector<1x8xf32> to vector<16x8xf32>
    %118 = arith.addf %115, %117 : vector<16x8xf32>
    %cst_38 = arith.constant 0.000000e+00 : f32
    %119 = vector.broadcast %cst_38 : f32 to vector<16x8xf32>
    %120 = arith.maximumf %118, %119 : vector<16x8xf32>
    %121 = vector.extract_strided_slice %16 {offsets = [16, 0], sizes = [8, 4], strides = [1, 1]} : vector<32x4xf32> to vector<8x4xf32>
    %cst_39 = arith.constant dense<0.000000e+00> : vector<16x4xf32>
    %122 = tpu.matmul %120, %121, %cst_39 {dimension_numbers = #tpu.dot_dimension_numbers<[1], [0], [0], [1], [0, 0, 1, 1], [], []>} : vector<16x8xf32>, vector<8x4xf32>, vector<16x4xf32> -> vector<16x4xf32>
    %123 = arith.addf %88, %122 : vector<16x4xf32>
    %124 = vector.extract_strided_slice %15 {offsets = [0, 3], sizes = [16, 1], strides = [1, 1]} : vector<16x8xf32> to vector<16x1xf32>
    %125 = vector.extract_strided_slice %15 {offsets = [0, 7], sizes = [16, 1], strides = [1, 1]} : vector<16x8xf32> to vector<16x1xf32>
    %126 = vector.broadcast %125 : vector<16x1xf32> to vector<16x16xf32>
    %127 = arith.mulf %11, %126 : vector<16x16xf32>
    %cst_40 = arith.constant dense<0.000000e+00> : vector<16xf32>
    %128 = vector.multi_reduction <add>, %127, %cst_40 [0] : vector<16x16xf32> to vector<16xf32>
    %129 = vector.shape_cast %128 : vector<16xf32> to vector<1x16xf32>
    %130 = vector.broadcast %124 : vector<16x1xf32> to vector<16x16xf32>
    %131 = vector.broadcast %129 : vector<1x16xf32> to vector<16x16xf32>
    %132 = arith.addf %130, %131 : vector<16x16xf32>
    %cst_41 = arith.constant 0.000000e+00 : f32
    %133 = vector.broadcast %cst_41 : f32 to vector<16x16xf32>
    %134 = arith.cmpf ogt, %132, %133 : vector<16x16xf32>
    %cst_42 = arith.constant 2.000000e-01 : f32
    %135 = vector.broadcast %cst_42 : f32 to vector<16x16xf32>
    %136 = arith.mulf %135, %132 : vector<16x16xf32>
    %137 = arith.select %134, %132, %136 : vector<16x16xi1>, vector<16x16xf32>
    %138 = arith.addf %137, %6 : vector<16x16xf32>
    %cst_43 = arith.constant dense<0xFF800000> : vector<16xf32>
    %139 = vector.multi_reduction <maximumf>, %138, %cst_43 [1] : vector<16x16xf32> to vector<16xf32>
    %140 = vector.shape_cast %139 : vector<16xf32> to vector<16x1xf32>
    %141 = vector.broadcast %140 : vector<16x1xf32> to vector<16x16xf32>
    %142 = arith.subf %138, %141 : vector<16x16xf32>
    %143 = math.exp %142 : vector<16x16xf32>
    %cst_44 = arith.constant dense<0.000000e+00> : vector<16xf32>
    %144 = vector.multi_reduction <add>, %143, %cst_44 [1] : vector<16x16xf32> to vector<16xf32>
    %145 = vector.shape_cast %144 : vector<16xf32> to vector<16x1xf32>
    %146 = tpu.reciprocal %145 {approx = true} : vector<16x1xf32> -> vector<16x1xf32>
    %147 = vector.broadcast %146 : vector<16x1xf32> to vector<16x16xf32>
    %148 = arith.mulf %143, %147 : vector<16x16xf32>
    %149 = vector.extract_strided_slice %13 {offsets = [0, 24], sizes = [16, 8], strides = [1, 1]} : vector<16x32xf32> to vector<16x8xf32>
    %cst_45 = arith.constant dense<0.000000e+00> : vector<16x8xf32>
    %150 = tpu.matmul %148, %149, %cst_45 {dimension_numbers = #tpu.dot_dimension_numbers<[1], [0], [0], [1], [0, 0, 1, 1], [], []>} : vector<16x16xf32>, vector<16x8xf32>, vector<16x8xf32> -> vector<16x8xf32>
    %151 = vector.extract_strided_slice %17 {offsets = [0, 24], sizes = [1, 8], strides = [1, 1]} : vector<1x32xf32> to vector<1x8xf32>
    %152 = vector.broadcast %151 : vector<1x8xf32> to vector<16x8xf32>
    %153 = arith.addf %150, %152 : vector<16x8xf32>
    %cst_46 = arith.constant 0.000000e+00 : f32
    %154 = vector.broadcast %cst_46 : f32 to vector<16x8xf32>
    %155 = arith.maximumf %153, %154 : vector<16x8xf32>
    %156 = vector.extract_strided_slice %16 {offsets = [24, 0], sizes = [8, 4], strides = [1, 1]} : vector<32x4xf32> to vector<8x4xf32>
    %cst_47 = arith.constant dense<0.000000e+00> : vector<16x4xf32>
    %157 = tpu.matmul %155, %156, %cst_47 {dimension_numbers = #tpu.dot_dimension_numbers<[1], [0], [0], [1], [0, 0, 1, 1], [], []>} : vector<16x8xf32>, vector<8x4xf32>, vector<16x4xf32> -> vector<16x4xf32>
    %158 = arith.addf %123, %157 : vector<16x4xf32>
    %c0_48 = arith.constant 0 : index
    %c0_49 = arith.constant 0 : index
    %159 = vector.load %arg6[%c0_48, %c0_49] : memref<2x4xf32, #tpu.memory_space<vmem>>, vector<2x4xf32>
    %160 = vector.extract_strided_slice %159 {offsets = [0, 0], sizes = [1, 4], strides = [1, 1]} : vector<2x4xf32> to vector<1x4xf32>
    %161 = vector.broadcast %160 : vector<1x4xf32> to vector<16x4xf32>
    %162 = arith.mulf %158, %161 : vector<16x4xf32>
    %cst_50 = arith.constant dense<0.000000e+00> : vector<16xf32>
    %163 = vector.multi_reduction <add>, %162, %cst_50 [1] : vector<16x4xf32> to vector<16xf32>
    %164 = vector.shape_cast %163 : vector<16xf32> to vector<16x1xf32>
    %165 = vector.extract_strided_slice %159 {offsets = [1, 0], sizes = [1, 4], strides = [1, 1]} : vector<2x4xf32> to vector<1x4xf32>
    %166 = vector.broadcast %165 : vector<1x4xf32> to vector<16x4xf32>
    %167 = arith.mulf %158, %166 : vector<16x4xf32>
    %cst_51 = arith.constant dense<0.000000e+00> : vector<16xf32>
    %168 = vector.multi_reduction <add>, %167, %cst_51 [1] : vector<16x4xf32> to vector<16xf32>
    %169 = vector.shape_cast %168 : vector<16xf32> to vector<16x1xf32>
    %170 = vector.broadcast %169 : vector<16x1xf32> to vector<16x16xf32>
    %171 = arith.mulf %11, %170 : vector<16x16xf32>
    %cst_52 = arith.constant dense<0.000000e+00> : vector<16xf32>
    %172 = vector.multi_reduction <add>, %171, %cst_52 [0] : vector<16x16xf32> to vector<16xf32>
    %173 = vector.shape_cast %172 : vector<16xf32> to vector<1x16xf32>
    %174 = vector.broadcast %164 : vector<16x1xf32> to vector<16x16xf32>
    %175 = vector.broadcast %173 : vector<1x16xf32> to vector<16x16xf32>
    %176 = arith.addf %174, %175 : vector<16x16xf32>
    %cst_53 = arith.constant 0.000000e+00 : f32
    %177 = vector.broadcast %cst_53 : f32 to vector<16x16xf32>
    %178 = arith.cmpf ogt, %176, %177 : vector<16x16xf32>
    %cst_54 = arith.constant 2.000000e-01 : f32
    %179 = vector.broadcast %cst_54 : f32 to vector<16x16xf32>
    %180 = arith.mulf %179, %176 : vector<16x16xf32>
    %181 = arith.select %178, %176, %180 : vector<16x16xi1>, vector<16x16xf32>
    %182 = arith.addf %181, %6 : vector<16x16xf32>
    %cst_55 = arith.constant dense<0xFF800000> : vector<16xf32>
    %183 = vector.multi_reduction <maximumf>, %182, %cst_55 [1] : vector<16x16xf32> to vector<16xf32>
    %184 = vector.shape_cast %183 : vector<16xf32> to vector<16x1xf32>
    %185 = vector.broadcast %184 : vector<16x1xf32> to vector<16x16xf32>
    %186 = arith.subf %182, %185 : vector<16x16xf32>
    %187 = math.exp %186 : vector<16x16xf32>
    %cst_56 = arith.constant dense<0.000000e+00> : vector<16xf32>
    %188 = vector.multi_reduction <add>, %187, %cst_56 [1] : vector<16x16xf32> to vector<16xf32>
    %189 = vector.shape_cast %188 : vector<16xf32> to vector<16x1xf32>
    %190 = tpu.reciprocal %189 {approx = true} : vector<16x1xf32> -> vector<16x1xf32>
    %191 = vector.broadcast %190 : vector<16x1xf32> to vector<16x16xf32>
    %192 = arith.mulf %187, %191 : vector<16x16xf32>
    %cst_57 = arith.constant dense<0.000000e+00> : vector<16x4xf32>
    %193 = tpu.matmul %192, %158, %cst_57 {dimension_numbers = #tpu.dot_dimension_numbers<[1], [0], [0], [1], [0, 0, 1, 1], [], []>} : vector<16x16xf32>, vector<16x4xf32>, vector<16x4xf32> -> vector<16x4xf32>
    %c0_58 = arith.constant 0 : index
    %c0_59 = arith.constant 0 : index
    %194 = vector.load %arg7[%c0_58, %c0_59] : memref<1x4xf32, #tpu.memory_space<vmem>>, vector<1x4xf32>
    %195 = vector.broadcast %194 : vector<1x4xf32> to vector<16x4xf32>
    %196 = arith.addf %193, %195 : vector<16x4xf32>
    %cst_60 = arith.constant dense<0xFF800000> : vector<16xf32>
    %197 = vector.multi_reduction <maximumf>, %196, %cst_60 [1] : vector<16x4xf32> to vector<16xf32>
    %198 = vector.shape_cast %197 : vector<16xf32> to vector<16x1xf32>
    %199 = vector.broadcast %198 : vector<16x1xf32> to vector<16x4xf32>
    %200 = arith.subf %196, %199 : vector<16x4xf32>
    %201 = math.exp %200 : vector<16x4xf32>
    %cst_61 = arith.constant dense<0.000000e+00> : vector<16xf32>
    %202 = vector.multi_reduction <add>, %201, %cst_61 [1] : vector<16x4xf32> to vector<16xf32>
    %203 = vector.shape_cast %202 : vector<16xf32> to vector<16x1xf32>
    %204 = math.log %203 : vector<16x1xf32>
    %205 = vector.broadcast %204 : vector<16x1xf32> to vector<16x4xf32>
    %206 = arith.subf %200, %205 : vector<16x4xf32>
    %cst_62 = arith.constant 0.000000e+00 : f32
    %207 = vector.broadcast %cst_62 : f32 to vector<16x128xf32>
    %c0_63 = arith.constant 0 : index
    %c0_64 = arith.constant 0 : index
    %208 = vector.load %arg8[%c0_63, %c0_64] : memref<16x128xf32, #tpu.memory_space<vmem>>, vector<16x128xf32>
    tpu.vector_store %arg8[%c0_63, %c0_64], %207 {strides = array<i32>} : memref<16x128xf32, #tpu.memory_space<vmem>>, vector<16x128xf32>,
    %c0_65 = arith.constant 0 : index
    %c0_66 = arith.constant 0 : index
    %209 = vector.load %arg8[%c0_65, %c0_66] : memref<16x128xf32, #tpu.memory_space<vmem>>, vector<16x4xf32>
    tpu.vector_store %arg8[%c0_65, %c0_66], %206 {strides = array<i32>} : memref<16x128xf32, #tpu.memory_space<vmem>>, vector<16x4xf32>,
    return
  }
}

</mosaic_0001>

<bundles_post_ra>
// kernel: gat_net_forward.1
= control target key start
LH: loop header
LB: loop body
LE: loop exit
PB: predicated region body
PF: predicated region fallthrough
CT: control target
= control target key end

     0   :  { %vm49_vm0 = vcmask 64512   ;;  %vm135_vm1 = vcmask 261120   ;;  %v1604_v13 = vmov 5   ;;  %v1605_v14 = vmov 4   ;;  %s1615_s24 = smov 112   ;;  %s1616_s25 = smov 104   ;;  %s1852_s2 = inlined_call_operand.vmem [shape: f32[8,32], index: 2, kind: input, shape index: {}]   ;;  %s1853_s0 = inlined_call_operand.vmem [shape: f32[16,8], index: 0, kind: input, shape index: {}]   ;;  %s1854_s3 = inlined_call_operand.vmem [shape: f32[32,8], index: 3, kind: input, shape index: {}]   ;;  %s1855_s8 = inlined_call_operand.vmem [shape: f32[16,128], index: 8, kind: output, shape index: {}]   ;;  %s1856_s1 = inlined_call_operand.vmem [shape: f32[16,16], index: 1, kind: input, shape index: {}]   ;;  %s1857_s4 = inlined_call_operand.vmem [shape: f32[1,32], index: 4, kind: input, shape index: {}]   ;;  %s1858_s5 = inlined_call_operand.vmem [shape: f32[32,4], index: 5, kind: input, shape index: {}]   ;;  %s1859_s6 = inlined_call_operand.vmem [shape: f32[2,4], index: 6, kind: input, shape index: {}]   ;;  %s1860_s7 = inlined_call_operand.vmem [shape: f32[1,4], index: 7, kind: input, shape index: {}]  }
   0x1   :  { %v48_v0 = vld [vmem:[%s1852_s2] sm:$0xff]  ;;  %v30_v2 = vld [vmem:[%s1853_s0 + $0x8] sm:$0xff]  ;;  %v133_v5 = vld [vmem:[%s1854_s3 + $0x10] sm:$0xff]  ;;  %1529 = vset.pattern.permute.xlu1 %v1604_v13  ;;  %1528 = vset.pattern.permute.xlu0 %v1605_v14  ;;  %v1606_v15 = vmov 0.0   ;;  %v1607_v18 = vmov 0   ;;  %v1608_v19 = vmov 6   ;;  %v37_v24 = vlaneseq }
   0x2   :  { %v29_v1 = vld [vmem:[%s1853_s0] sm:$0xff]  ;;  %1410 = vmatprep.subr.mxu0 %v48_v0  ;;  %v132_v4 = vld [vmem:[%s1854_s3 + $0x8] sm:$0xff]  ;;  %v134_v7 = vld [vmem:[%s1854_s3 + $0x18] sm:$0xff]  ;;  %1335 = vst [vmem:[%s1855_s8] sm:$0xff] %v1606_v15  ;;  %v1609_v20 = vmov 1   ;;  %v1610_v21 = vmov 7   ;;  %v1611_v22 = vmov 2  }
   0x3   :  { %1412 = vmatprep.mubr.msk.f32.mxu0 %vm49_vm0, %v29_v1  ;;  %v131_v3 = vld [vmem:[%s1854_s3] sm:$0xff]  ;;  %1411 = vmatpush3.msra.mxu0 %v48_v0  ;;  %v1485_v8 = vpack.c.bf16 %v134_v7, %v133_v5  ;;  %1336 = vst [vmem:[%s1855_s8 + $0x8] sm:$0xff] %v1606_v15  ;;  %v1612_v23 = vmov 3   ;;  %v1693_v25 = vshrl.u32 %v37_v24, 7  ;;  %v41_v26 = vand.u32 127, %v37_v24  ;;  %v32_v58 = vld [vmem:[%s1856_s1 + $0x8] sm:$0xff] }
   0x4   :  { %v1481_v6 = vpack.c.bf16 %v132_v4, %v131_v3  ;;  %1413 = vmatmul.mubr.msk.f32.vlgmr.msra.gmra.mrb[0].mxu0 %vm49_vm0, %v30_v2  ;;  %vm234_vm4 = vcmask 130048   ;;  %v31_v61 = vld [vmem:[%s1856_s1] sm:$0xff]  ;;  %vm34_vm5 = vcmp.gt.f32.partialorder %v32_v58, 0.0  ;;  %s1614_s1 = smov 120   ;;  %vm1161_vm15 = vcmask 31744  }
   0x5   :  { %v39_v27 = vadd.s32 8, %v1693_v25  ;;  %vm42_vm2 = vcmp.eq.s32.totalorder %v1693_v25, %v41_v26  ;;  %vm33_vm6 = vcmp.gt.f32.partialorder %v31_v61, 0.0 }
   0x6   :  { %1482 = vmatprep.subr.bf16.mxu1 %v1481_v6  ;;  %v1697_v28 = vsel %vm42_vm2, 1.0, %v1606_v15 }
   0x7   :  { %1484 = vmatpush3.bf16.msra.mxu1 %v1481_v6  ;;  %vm43_vm3 = vcmp.eq.s32.totalorder %v39_v27, %v41_v26 }
   0x8   :  { %1486 = vmatprep.subr.bf16.mxu1 %v1485_v8  ;;  %v1699_v31 = vsel %vm43_vm3, 1.0, %v1606_v15 }
   0xb   :  { %1488 = vmatpush3.bf16.msra.mxu1 %v1485_v8 }
  0xd7   :  { %v1414_v9 = vpop.f32.mrb[0].mxu0 }
  0xd8   :  { %v122_v10 = vpop.f32.mrb[1].mxu0 }
  0xd9   :  { %1423 = vmatprep.mubr.msk.f32.mxu1 %vm135_vm1, %v122_v10  ;;  %v1489_v11 = vpack.c.bf16 %v1414_v9, %v122_v10  ;;  %v1685_v12 = vpack.i.bf16 %v1414_v9, %v122_v10  ;;  %v1613_v10 = vmov -1e+30  }
  0xda   :  { %1424 = vmatmul.mubr.msk.f32.vlgmr.msra.gmra.mrb[0].mxu1 %vm135_vm1, %v1414_v9  ;;  %v1721_v13 = vsel %vm33_vm6, 0.0, %v1613_v10 }
  0xdb   :  { %1490 = vmatprep.subr.bf16.mxu0 %v1489_v11 }
  0xdc   :  { %1492 = vmatpush3.bf16.msra.mxu0 %v1489_v11  ;;  %v1719_v11 = vsel %vm34_vm5, 0.0, %v1613_v10 }
 0x1ad   :  { %v1425_v16 = vpop.f32.mrb[0].mxu1 }
 0x1ae   :  { %v208_v17 = vpop.f32.mrb[1].mxu1 }
 0x1af   :  { %374 = vperm.xlu1 %1529, %v208_v17   ;;  %224 = vperm.xlu0 %1528, %v208_v17  }
 0x1b3   :  { %378 = vperm.xlu1 %1529, %v1425_v16   ;;  %229 = vperm.xlu0 %1528, %v1425_v16  }
 0x1b7   :  { %1530 = vset.pattern.permute.xlu1 %v1607_v18  ;;  %1531 = vset.pattern.permute.xlu0 %v1607_v18 }
 0x1b8   :  { %249 = vperm.xlu1 %1530, %v1425_v16   ;;  %245 = vperm.xlu0 %1531, %v208_v17  }
 0x1bc   :  { %1533 = vset.pattern.permute.xlu1 %v1608_v19  ;;  %1532 = vset.pattern.permute.xlu0 %v1608_v19 }
 0x1bd   :  { %687 = vperm.xlu1 %1533, %v208_v17   ;;  %691 = vperm.xlu0 %1532, %v1425_v16  }
 0x1c1   :  { %1534 = vset.pattern.permute.xlu1 %v1609_v20  ;;  %1535 = vset.pattern.permute.xlu0 %v1610_v21 }
 0x1c2   :  { %393 = vperm.xlu1 %1534, %v208_v17   ;;  %921 = vperm.xlu0 %1535, %v208_v17  }
 0x1c6   :  { %397 = vperm.xlu1 %1534, %v1425_v16   ;;  %1538 = vset.pattern.permute.xlu0 %v1611_v22 }
 0x1c7   :  { %710 = vperm.xlu0 %1538, %v1425_v16  }
 0x1ca   :  { %1536 = vset.pattern.permute.xlu1 %v1610_v21 }
 0x1cb   :  { %925 = vperm.xlu1 %1536, %v1425_v16   ;;  %1555 = vset.pattern.permute.xlu0 %v1612_v23 }
 0x1cf   :  { %1537 = vset.pattern.permute.xlu1 %v1611_v22 }
 0x1d0   :  { %706 = vperm.xlu1 %1537, %v208_v17  }
 0x1d4   :  { %1539 = vset.pattern.permute.xlu1 %v1612_v23 }
 0x1d5   :  { %940 = vperm.xlu1 %1539, %v208_v17  }
 0x1d9   :  { %944 = vperm.xlu1 %1539, %v1425_v16  }
 0x22e   :  { %v375_v29 = vpop.permute.xlu1 %374  ;;  %v225_v30 = vpop.permute.xlu0 %224 }
 0x22f   :  { %v381_v32 = vmul.f32 %v1697_v28, %v375_v29  ;;  %v232_v33 = vmul.f32 %v1697_v28, %v225_v30 }
 0x231   :  { %v383_v38 = vsel %vm234_vm4, %v381_v32, 0.0  ;;  %v235_v39 = vsel %vm234_vm4, %v232_v33, 0.0 }
 0x232   :  { %v379_v34 = vpop.permute.xlu1 %378  ;;  %v230_v35 = vpop.permute.xlu0 %229 }
 0x233   :  { %v382_v36 = vmul.f32 %v1699_v31, %v379_v34  ;;  %v233_v37 = vmul.f32 %v1699_v31, %v230_v35 }
 0x235   :  { %v384_v40 = vsel %vm234_vm4, %v382_v36, 0.0  ;;  %v236_v41 = vsel %vm234_vm4, %v233_v37, 0.0 }
 0x236   :  { %v385_v42 = vadd.f32 %v384_v40, %v383_v38  ;;  %v237_v43 = vadd.f32 %v236_v41, %v235_v39 }
 0x237   :  { %v250_v44 = vpop.permute.xlu1 %249  ;;  %v246_v45 = vpop.permute.xlu0 %245 }
 0x238   :  { %v386_v46 = vrot.slane %v385_v42, 4  ;;  %v238_v47 = vrot.slane %v237_v43, 4 }
 0x23a   :  { %v387_v48 = vadd.f32 %v386_v46, %v385_v42  ;;  %v239_v49 = vadd.f32 %v238_v47, %v237_v43 }
 0x23c   :  { %v240_v50 = vrot.slane %v239_v49, 2  ;;  %v688_v51 = vpop.permute.xlu1 %687  ;;  %v692_v52 = vpop.permute.xlu0 %691  ;;  %v388_v53 = vrot.slane %v387_v48, 2 }
 0x23d   :  { %v694_v54 = vmul.f32 %v1697_v28, %v688_v51  ;;  %v695_v55 = vmul.f32 %v1699_v31, %v692_v52 }
 0x23e   :  { %v241_v56 = vadd.f32 %v240_v50, %v239_v49  ;;  %v389_v57 = vadd.f32 %v388_v53, %v387_v48 }
 0x23f   :  { %v696_v59 = vsel %vm234_vm4, %v694_v54, 0.0  ;;  %v697_v60 = vsel %vm234_vm4, %v695_v55, 0.0 }
 0x240   :  { %v242_v62 = vrot.slane %v241_v56, 1  ;;  %v698_v63 = vadd.f32 %v697_v60, %v696_v59  ;;  %v390_v0 = vrot.slane %v389_v57, 1 }
 0x241   :  { %v394_v1 = vpop.permute.xlu1 %393  ;;  %v922_v16 = vpop.permute.xlu0 %921 }
 0x242   :  { %v243_v2 = vadd.f32 %v242_v62, %v241_v56  ;;  %v699_v3 = vrot.slane %v698_v63, 4  ;;  %v391_v4 = vadd.f32 %v390_v0, %v389_v57  ;;  %v928_v22 = vmul.f32 %v1697_v28, %v922_v16 }
 0x244   :  { %v253_v5 = vadd.f32 %v250_v44, %v243_v2  ;;  %v252_v6 = vadd.f32 %v246_v45, %v243_v2  ;;  %v700_v7 = vadd.f32 %v699_v3, %v698_v63  ;;  %v400_v8 = vadd.f32 %v394_v1, %v391_v4 }
 0x245   :  { %v398_v9 = vpop.permute.xlu1 %397  ;;  %v930_v37 = vsel %vm234_vm4, %v928_v22, 0.0 }
 0x246   :  { %vm255_vm7 = vcmp.gt.f32.partialorder %v253_v5, 0.0  ;;  %v257_v14 = vmul.f32 0.2, %v253_v5  ;;  %vm254_vm8 = vcmp.gt.f32.partialorder %v252_v6, 0.0  ;;  %v256_v15 = vmul.f32 0.2, %v252_v6  ;;  %v711_v41 = vpop.permute.xlu0 %710 }
 0x247   :  { %vm402_vm9 = vcmp.gt.f32.partialorder %v400_v8, 0.0  ;;  %v404_v17 = vmul.f32 0.2, %v400_v8  ;;  %v401_v18 = vadd.f32 %v398_v9, %v391_v4  ;;  %v701_v19 = vrot.slane %v700_v7, 2 }
 0x248   :  { %v259_v20 = vsel %vm255_vm7, %v253_v5, %v257_v14  ;;  %v258_v21 = vsel %vm254_vm8, %v252_v6, %v256_v15 }
 0x249   :  { %v405_v23 = vmul.f32 0.2, %v401_v18  ;;  %v702_v24 = vadd.f32 %v701_v19, %v700_v7  ;;  %v1725_v26 = vadd.f32 %v259_v20, %v1719_v11  ;;  %vm403_vm10 = vcmp.gt.f32.partialorder %v401_v18, 0.0 }
 0x24a   :  { %v926_v27 = vpop.permute.xlu1 %925  ;;  %v260_v29 = vadd.f32 %v258_v21, %v1721_v13  ;;  %v406_v30 = vsel %vm402_vm9, %v400_v8, %v404_v17 }
 0x24b   :  { %v703_v32 = vrot.slane %v702_v24, 1  ;;  %v929_v33 = vmul.f32 %v1699_v31, %v926_v27  ;;  %v265_v34 = vsel %vm234_vm4, %v1725_v26, -inf  ;;  %v408_v36 = vadd.f32 %v406_v30, %v1721_v13 }
 0x24c   :  { %266 = vmax.xlane.f32.xlu1 %v265_v34  ;;  %v262_v35 = vsel %vm234_vm4, %v260_v29, -inf  ;;  %v407_v40 = vsel %vm403_vm10, %v401_v18, %v405_v23 }
 0x24d   :  { %v704_v38 = vadd.f32 %v703_v32, %v702_v24  ;;  %v931_v39 = vsel %vm234_vm4, %v929_v33, 0.0  ;;  %263 = vmax.xlane.f32.xlu0 %v262_v35  ;;  %v410_v47 = vsel %vm234_vm4, %v408_v36, -inf  ;;  %v409_v48 = vadd.f32 %v407_v40, %v1719_v11 }
 0x24e   :  { %v932_v42 = vadd.f32 %v931_v39, %v930_v37 }
 0x24f   :  { %v714_v43 = vadd.f32 %v711_v41, %v704_v38  ;;  %v707_v44 = vpop.permute.xlu1 %706  ;;  %v413_v54 = vsel %vm234_vm4, %v409_v48, -inf }
 0x250   :  { %v933_v45 = vrot.slane %v932_v42, 4  ;;  %v713_v46 = vadd.f32 %v707_v44, %v704_v38 }
 0x251   :  { %vm716_vm11 = vcmp.gt.f32.partialorder %v714_v43, 0.0  ;;  %v718_v49 = vmul.f32 0.2, %v714_v43  ;;  %411 = vmax.xlane.f32.xlu0 %v410_v47 }
 0x252   :  { %v934_v50 = vadd.f32 %v933_v45, %v932_v42  ;;  %vm715_vm12 = vcmp.gt.f32.partialorder %v713_v46, 0.0  ;;  %v717_v51 = vmul.f32 0.2, %v713_v46 }
 0x253   :  { %v720_v52 = vsel %vm716_vm11, %v714_v43, %v718_v49 }
 0x254   :  { %v935_v53 = vrot.slane %v934_v50, 2  ;;  %v719_v55 = vsel %vm715_vm12, %v713_v46, %v717_v51  ;;  %v722_v56 = vadd.f32 %v720_v52, %v1719_v11  ;;  %v941_v57 = vpop.permute.xlu1 %940 }
 0x255   :  { %414 = vmax.xlane.f32.xlu0 %v413_v54  ;;  %v1740_v58 = vadd.f32 %v719_v55, %v1721_v13 }
 0x256   :  { %v936_v59 = vadd.f32 %v935_v53, %v934_v50  ;;  %v726_v62 = vsel %vm234_vm4, %v722_v56, -inf }
 0x257   :  { %v723_v60 = vsel %vm234_vm4, %v1740_v58, -inf }
 0x258   :  { %v937_v61 = vrot.slane %v936_v59, 1  ;;  %724 = vmax.xlane.f32.xlu1 %v723_v60  ;;  %v945_v0 = vpop.permute.xlu1 %944 }
 0x259   :  { %727 = vmax.xlane.f32.xlu0 %v726_v62 }
 0x25a   :  { %v938_v63 = vadd.f32 %v937_v61, %v936_v59 }
 0x25c   :  { %v947_v1 = vadd.f32 %v941_v57, %v938_v63  ;;  %v948_v2 = vadd.f32 %v945_v0, %v938_v63  ;;  %v1777_v57 = vld [vmem:[%s1857_s4] ss:$0 sm:$0xff] }
 0x25e   :  { %vm949_vm13 = vcmp.gt.f32.partialorder %v947_v1, 0.0  ;;  %v951_v3 = vmul.f32 0.2, %v947_v1  ;;  %vm950_vm14 = vcmp.gt.f32.partialorder %v948_v2, 0.0  ;;  %v952_v4 = vmul.f32 0.2, %v948_v2 }
 0x260   :  { %v953_v5 = vsel %vm949_vm13, %v947_v1, %v951_v3  ;;  %v954_v6 = vsel %vm950_vm14, %v948_v2, %v952_v4 }
 0x261   :  { %v955_v7 = vadd.f32 %v953_v5, %v1721_v13  ;;  %v956_v8 = vadd.f32 %v954_v6, %v1719_v11 }
 0x263   :  { %v957_v9 = vsel %vm234_vm4, %v955_v7, -inf  ;;  %v960_v10 = vsel %vm234_vm4, %v956_v8, -inf }
 0x264   :  { %958 = vmax.xlane.f32.xlu1 %v957_v9  ;;  %961 = vmax.xlane.f32.xlu0 %v960_v10 }
 0x2d9   :  { %v267_v14 = vpop.xlane.xlu1 %266 }
 0x2da   :  { %v269_v15 = vsub.f32 %v1725_v26, %v267_v14  ;;  %v264_v16 = vpop.xlane.xlu0 %263 }
 0x2db   :  { %v268_v17 = vsub.f32 %v260_v29, %v264_v16 }
 0x2dc   :  { %v272_v18 = vmul.f32 1.442695, %v269_v15 }
 0x2dd   :  { %v270_v19 = vmul.f32 1.442695, %v268_v17 }
 0x2de   :  { %1556 = vpow2.f32 %v272_v18  ;;  %v412_v20 = vpop.xlane.xlu0 %411 }
 0x2df   :  { %1558 = vpow2.f32 %v270_v19  ;;  %v416_v21 = vsub.f32 %v408_v36, %v412_v20 }
 0x2e1   :  { %v418_v22 = vmul.f32 1.442695, %v416_v21 }
 0x2e2   :  { %v415_v23 = vpop.xlane.xlu0 %414 }
 0x2e3   :  { %1560 = vpow2.f32 %v418_v22  ;;  %v417_v24 = vsub.f32 %v409_v48, %v415_v23 }
 0x2e5   :  { %v420_v27 = vmul.f32 1.442695, %v417_v24  ;;  %v725_v37 = vpop.xlane.xlu1 %724 }
 0x2e6   :  { %v728_v30 = vpop.xlane.xlu0 %727  ;;  %v729_v53 = vsub.f32 %v1740_v58, %v725_v37 }
 0x2e7   :  { %1562 = vpow2.f32 %v420_v27  ;;  %v730_v32 = vsub.f32 %v722_v56, %v728_v30 }
 0x2e8   :  { %v1557_v33 = vpop.eup %1556  ;;  %v731_v54 = vmul.f32 1.442695, %v729_v53 }
 0x2e9   :  { %v1750_v34 = vpop.eup %1558  ;;  %v733_v26 = vmul.f32 1.442695, %v730_v32  ;;  %v277_v29 = vsel %vm234_vm4, %v1557_v33, 0.0 }
 0x2ea   :  { %278 = vadd.xlane.f32.xlu0 %v277_v29  ;;  %v274_v35 = vsel %vm234_vm4, %v1750_v34, 0.0 }
 0x2eb   :  { %1564 = vpow2.f32 %v733_v26  ;;  %275 = vadd.xlane.f32.xlu1 %v274_v35  ;;  %v218_v35 = vld [vmem:[%s1858_s5 + $0x8] sm:$0xff] }
 0x2ec   :  { %1440 = vmatprep.subr.mxu1 %v218_v35 }
 0x2ed   :  { %v1561_v36 = vpop.eup %1560  ;;  %1441 = vmatpush3.msra.mxu1 %v218_v35 }
 0x2ee   :  { %v422_v38 = vsel %vm234_vm4, %v1561_v36, 0.0 }
 0x2ef   :  { %423 = vadd.xlane.f32.xlu1 %v422_v38 }
 0x2f1   :  { %v1563_v39 = vpop.eup %1562  ;;  %v959_v40 = vpop.xlane.xlu1 %958 }
 0x2f2   :  { %v962_v41 = vpop.xlane.xlu0 %961  ;;  %v963_v42 = vsub.f32 %v955_v7, %v959_v40  ;;  %v425_v44 = vsel %vm234_vm4, %v1563_v39, 0.0 }
 0x2f3   :  { %v964_v43 = vsub.f32 %v956_v8, %v962_v41  ;;  %426 = vadd.xlane.f32.xlu0 %v425_v44 }
 0x2f4   :  { %v965_v45 = vmul.f32 1.442695, %v963_v42 }
 0x2f5   :  { %v967_v46 = vmul.f32 1.442695, %v964_v43  ;;  %v1757_v47 = vpop.eup %1564 }
 0x2f6   :  { %1566 = vpow2.f32 %v965_v45  ;;  %v738_v48 = vsel %vm234_vm4, %v1757_v47, 0.0 }
 0x2f7   :  { %739 = vadd.xlane.f32.xlu0 %v738_v48  ;;  %1568 = vpow2.f32 %v967_v46  ;;  %v219_v48 = vld [vmem:[%s1858_s5 + $0x10] sm:$0xff] }
 0x2f8   :  { %1570 = vpow2.f32 %v731_v54 }
 0x300   :  { %v1761_v49 = vpop.eup %1566  ;;  %1541 = vrot.lane.b32.xlu1 %v1685_v12, %s1614_s1 }
 0x301   :  { %v969_v50 = vsel %vm234_vm4, %v1761_v49, 0.0  ;;  %v1766_v51 = vpop.eup %1568 }
 0x302   :  { %970 = vadd.xlane.f32.xlu0 %v969_v50  ;;  %v972_v52 = vsel %vm234_vm4, %v1766_v51, 0.0  ;;  %v1571_v55 = vpop.eup %1570 }
 0x303   :  { %v735_v56 = vsel %vm234_vm4, %v1571_v55, 0.0 }
 0x306   :  { %973 = vadd.xlane.f32.xlu0 %v972_v52 }
 0x31c   :  { %1546 = vrot.lane.b32.xlu0 %v1685_v12, %s1615_s24 }
 0x324   :  { %736 = vadd.xlane.f32.xlu1 %v735_v56 }
 0x335   :  { %1551 = vrot.lane.b32.xlu1 %v1685_v12, %s1616_s25 }
 0x339   :  { %438 = vrot.lane.b32.xlu1 %v1777_v57, %s1614_s1 }
 0x33d   :  { %751 = vrot.lane.b32.xlu1 %v1777_v57, %s1615_s24 }
 0x341   :  { %985 = vrot.lane.b32.xlu1 %v1777_v57, %s1616_s25 }
 0x377   :  { %v279_v58 = vpop.xlane.xlu0 %278 }
 0x378   :  { %v276_v59 = vpop.xlane.xlu1 %275  ;;  %1572 = vrcp.f32 %v279_v58 }
 0x379   :  { %1574 = vrcp.f32 %v276_v59 }
 0x37c   :  { %v424_v60 = vpop.xlane.xlu1 %423 }
 0x37d   :  { %1576 = vrcp.f32 %v424_v60 }
 0x380   :  { %v1542_v61 = vpop.permute.xlu1 %1541  ;;  %v427_v62 = vpop.xlane.xlu0 %426 }
 0x381   :  { %v1544_v12 = vunpack.i.h.bf16 %v1542_v61  ;;  %v1543_v63 = vunpack.i.l.bf16 %v1542_v61  ;;  %1578 = vrcp.f32 %v427_v62 }
 0x382   :  { %v1573_v0 = vpop.eup %1572 }
 0x383   :  { %v1575_v1 = vpop.eup %1574  ;;  %v283_v2 = vmul.f32 %v1573_v0, %v1557_v33  ;;  %v1493_v3 = vpack.c.bf16 %v1544_v12, %v1543_v63 }
 0x384   :  { %v282_v4 = vmul.f32 %v1575_v1, %v1750_v34  ;;  %v740_v8 = vpop.xlane.xlu0 %739  ;;  %v1170_v1 = vsub.s32 1, %v1693_v25 }
 0x385   :  { %1494 = vmatprep.subr.bf16.mxu0 %v1493_v3  ;;  %1580 = vrcp.f32 %v740_v8 }
 0x386   :  { %1430 = vmatprep.mubr.msk.f32.mxu0 %vm234_vm4, %v282_v4 }
 0x387   :  { %v1577_v5 = vpop.eup %1576  ;;  %1431 = vmatmul.mubr.msk.f32.vlgmr.msra.gmra.mrb[2].mxu0 %vm234_vm4, %v283_v2  ;;  %v1154_v2 = vld [vmem:[%s1859_s6] sm:$0x3] }
 0x388   :  { %1496 = vmatpush3.bf16.msra.mxu0 %v1493_v3  ;;  %v430_v6 = vmul.f32 %v1577_v5, %v1561_v36  ;;  %v217_v36 = vld [vmem:[%s1858_s5] sm:$0xff]  ;;  %v1157_v3 = vsub.s32 0, %v1693_v25  ;;  %v1171_v4 = vrot.slane %v1154_v2, %v1170_v1 }
 0x389   :  { %1445 = vmatprep.subr.mxu1 %v217_v36 }
 0x38a   :  { %1437 = vmatprep.mubr.msk.f32.mxu0 %vm234_vm4, %v430_v6  ;;  %v1158_v6 = vrot.slane %v1154_v2, %v1157_v3 }
 0x38b   :  { %v1579_v7 = vpop.eup %1578 }
 0x38c   :  { %v431_v9 = vmul.f32 %v1579_v7, %v1563_v39 }
 0x38e   :  { %1438 = vmatmul.mubr.msk.f32.vlgmr.msra.gmra.mrb[4].mxu0 %vm234_vm4, %v431_v9 }
 0x38f   :  { %v971_v10 = vpop.xlane.xlu0 %970  ;;  %v1581_v24 = vpop.eup %1580 }
 0x390   :  { %1582 = vrcp.f32 %v971_v10  ;;  %v744_v33 = vmul.f32 %v1581_v24, %v1757_v47 }
 0x393   :  { %v974_v14 = vpop.xlane.xlu0 %973 }
 0x397   :  { %v1547_v15 = vpop.permute.xlu0 %1546 }
 0x398   :  { %v1549_v16 = vunpack.i.h.bf16 %v1547_v15  ;;  %v1548_v17 = vunpack.i.l.bf16 %v1547_v15 }
 0x39a   :  { %v1497_v18 = vpack.c.bf16 %v1549_v16, %v1548_v17  ;;  %v1583_v27 = vpop.eup %1582 }
 0x39b   :  { %v977_v26 = vmul.f32 %v1583_v27, %v1761_v49 }
 0x39c   :  { %1498 = vmatprep.subr.bf16.mxu0 %v1497_v18 }
 0x39d   :  { %1500 = vmatpush3.bf16.msra.mxu0 %v1497_v18 }
 0x3b1   :  { %v737_v19 = vpop.xlane.xlu1 %736 }
 0x3b2   :  { %1584 = vrcp.f32 %v737_v19 }
 0x3b3   :  { %1586 = vrcp.f32 %v974_v14 }
 0x3b5   :  { %v1552_v20 = vpop.permute.xlu1 %1551 }
 0x3b6   :  { %v1554_v21 = vunpack.i.h.bf16 %v1552_v20  ;;  %v1553_v22 = vunpack.i.l.bf16 %v1552_v20 }
 0x3b8   :  { %v1501_v23 = vpack.c.bf16 %v1554_v21, %v1553_v22 }
 0x3b9   :  { %v439_v39 = vpop.permute.xlu1 %438 }
 0x3ba   :  { %1502 = vmatprep.subr.bf16.mxu0 %v1501_v23 }
 0x3bc   :  { %v1585_v30 = vpop.eup %1584 }
 0x3bd   :  { %v743_v32 = vmul.f32 %v1585_v30, %v1571_v55  ;;  %v1587_v34 = vpop.eup %1586  ;;  %v752_v52 = vpop.permute.xlu1 %751 }
 0x3be   :  { %v978_v29 = vmul.f32 %v1587_v34, %v1766_v51  ;;  %v220_v51 = vld [vmem:[%s1858_s5 + $0x18] sm:$0xff] }
 0x3bf   :  { %1454 = vmatprep.mubr.msk.f32.mxu0 %vm234_vm4, %v743_v32 }
 0x3c0   :  { %1455 = vmatmul.mubr.msk.f32.vlgmr.msra.gmra.mrb[6].mxu0 %vm234_vm4, %v744_v33 }
 0x3c1   :  { %1504 = vmatpush3.bf16.msra.mxu0 %v1501_v23  ;;  %1466 = vmatprep.mubr.msk.f32.mxu0 %vm234_vm4, %v977_v26  ;;  %v986_v58 = vpop.permute.xlu1 %985 }
 0x3c4   :  { %1467 = vmatmul.mubr.msk.f32.vlgmr.msra.gmra.mrb[8].mxu0 %vm234_vm4, %v978_v29 }
 0x45a   :  { %v1432_v37 = vpop.f32.mrb[2].mxu0 }
 0x45b   :  { %v362_v38 = vpop.f32.mrb[3].mxu0  ;;  %v368_v49 = vadd.f32 %v1432_v37, %v1777_v57 }
 0x45c   :  { %v363_v43 = vadd.f32 %v1777_v57, %v362_v38 }
 0x45d   :  { %v372_v50 = vmax.f32 %v368_v49, 0.0 }
 0x45e   :  { %v371_v47 = vmax.f32 %v363_v43, 0.0 }
 0x461   :  { %v1439_v40 = vpop.f32.mrb[4].mxu0 }
 0x462   :  { %v519_v41 = vadd.f32 %v1439_v40, %v439_v39  ;;  %v513_v42 = vpop.f32.mrb[5].mxu0 }
 0x463   :  { %v514_v44 = vadd.f32 %v513_v42, %v439_v39 }
 0x464   :  { %v523_v46 = vmax.f32 %v519_v41, 0.0 }
 0x465   :  { %v522_v45 = vmax.f32 %v514_v44, 0.0 }
 0x467   :  { %1442 = vmatprep.mubr.msk.f32.mxu1 %vm49_vm0, %v522_v45 }
 0x468   :  { %1443 = vmatmul.mubr.msk.f32.vlgmr.msra.gmra.mrb[2].mxu1 %vm49_vm0, %v523_v46 }
 0x469   :  { %1447 = vmatprep.mubr.msk.f32.mxu1 %vm49_vm0, %v371_v47  ;;  %1446 = vmatpush3.msra.mxu1 %v217_v36 }
 0x46a   :  { %1457 = vmatprep.subr.mxu1 %v219_v48 }
 0x470   :  { %1448 = vmatmul.mubr.msk.f32.vlgmr.msra.gmra.mrb[2].mxu1 %vm49_vm0, %v372_v50 }
 0x471   :  { %1458 = vmatpush3.msra.mxu1 %v219_v48 }
 0x472   :  { %1469 = vmatprep.subr.mxu1 %v220_v51 }
 0x493   :  { %v1456_v53 = vpop.f32.mrb[6].mxu0 }
 0x494   :  { %v832_v54 = vadd.f32 %v1456_v53, %v752_v52  ;;  %v826_v55 = vpop.f32.mrb[7].mxu0 }
 0x495   :  { %v827_v56 = vadd.f32 %v826_v55, %v752_v52 }
 0x496   :  { %v836_v61 = vmax.f32 %v832_v54, 0.0 }
 0x497   :  { %v835_v59 = vmax.f32 %v827_v56, 0.0  ;;  %v1468_v60 = vpop.f32.mrb[8].mxu0 }
 0x498   :  { %v1060_v57 = vpop.f32.mrb[9].mxu0  ;;  %v1066_v63 = vadd.f32 %v1468_v60, %v986_v58  ;;  %v1366_v60 = vld [vmem:[%s1860_s7] ss:$0 sm:$0xff] }
 0x499   :  { %v1061_v62 = vadd.f32 %v1060_v57, %v986_v58  ;;  %1459 = vmatprep.mubr.msk.f32.mxu1 %vm49_vm0, %v835_v59 }
 0x49a   :  { %1460 = vmatmul.mubr.msk.f32.vlgmr.msra.gmra.mrb[2].mxu1 %vm49_vm0, %v836_v61  ;;  %v1070_v0 = vmax.f32 %v1066_v63, 0.0 }
 0x49b   :  { %v1069_v12 = vmax.f32 %v1061_v62, 0.0  ;;  %1470 = vmatpush3.msra.mxu1 %v220_v51 }
 0x49d   :  { %1471 = vmatprep.mubr.msk.f32.mxu1 %vm49_vm0, %v1069_v12 }
 0x4a2   :  { %1472 = vmatmul.mubr.msk.f32.vlgmr.msra.gmra.mrb[2].mxu1 %vm49_vm0, %v1070_v0 }
 0x575   :  { %v1473_v5 = vpop.f32.mrb[2].mxu1 }
 0x576   :  { %v1143_v7 = vpop.f32.mrb[3].mxu1  ;;  %v1173_v8 = vmul.f32 %v1473_v5, %v1171_v4  ;;  %v1160_v25 = vmul.f32 %v1473_v5, %v1158_v6 }
 0x577   :  { %v1172_v9 = vmul.f32 %v1171_v4, %v1143_v7  ;;  %v1505_v10 = vpack.c.bf16 %v1473_v5, %v1143_v7  ;;  %v1159_v15 = vmul.f32 %v1158_v6, %v1143_v7 }
 0x578   :  { %v1177_v14 = vsel %vm1161_vm15, %v1173_v8, 0.0  ;;  %v1165_v18 = vsel %vm1161_vm15, %v1160_v25, 0.0 }
 0x579   :  { %1178 = vadd.xlane.f32.xlu1 %v1177_v14  ;;  %1506 = vmatprep.subr.bf16.mxu0 %v1505_v10  ;;  %v1174_v16 = vsel %vm1161_vm15, %v1172_v9, 0.0  ;;  %v1162_v17 = vsel %vm1161_vm15, %v1159_v15, 0.0 }
 0x57a   :  { %1508 = vmatpush3.bf16.msra.mxu0 %v1505_v10  ;;  %1175 = vadd.xlane.f32.xlu0 %v1174_v16 }
 0x57e   :  { %1163 = vadd.xlane.f32.xlu0 %v1162_v17 }
 0x582   :  { %1166 = vadd.xlane.f32.xlu0 %v1165_v18 }
 0x606   :  { %v1179_v19 = vpop.xlane.xlu1 %1178 }
 0x607   :  { %v1181_v20 = vmul.f32 %v1699_v31, %v1179_v19  ;;  %v1176_v21 = vpop.xlane.xlu0 %1175 }
 0x608   :  { %v1180_v22 = vmul.f32 %v1697_v28, %v1176_v21 }
 0x609   :  { %v1183_v23 = vsel %vm234_vm4, %v1181_v20, 0.0 }
 0x60a   :  { %v1182_v24 = vsel %vm234_vm4, %v1180_v22, 0.0 }
 0x60b   :  { %v1184_v27 = vadd.f32 %v1183_v23, %v1182_v24  ;;  %v1164_v34 = vpop.xlane.xlu0 %1163 }
 0x60d   :  { %v1185_v30 = vrot.slane %v1184_v27, 4 }
 0x60f   :  { %v1186_v32 = vadd.f32 %v1185_v30, %v1184_v27  ;;  %v1167_v36 = vpop.xlane.xlu0 %1166 }
 0x611   :  { %v1187_v33 = vrot.slane %v1186_v32, 2 }
 0x613   :  { %v1188_v26 = vadd.f32 %v1187_v33, %v1186_v32 }
 0x615   :  { %v1189_v29 = vrot.slane %v1188_v26, 1 }
 0x617   :  { %v1190_v35 = vadd.f32 %v1189_v29, %v1188_v26 }
 0x619   :  { %v1191_v37 = vadd.f32 %v1190_v35, %v1164_v34  ;;  %v1192_v38 = vadd.f32 %v1190_v35, %v1167_v36 }
 0x61b   :  { %vm1193_vm0 = vcmp.gt.f32.partialorder %v1191_v37, 0.0  ;;  %v1195_v31 = vmul.f32 0.2, %v1191_v37  ;;  %vm1194_vm1 = vcmp.gt.f32.partialorder %v1192_v38, 0.0  ;;  %v1196_v39 = vmul.f32 0.2, %v1192_v38 }
 0x61d   :  { %v1197_v28 = vsel %vm1193_vm0, %v1191_v37, %v1195_v31  ;;  %v1198_v40 = vsel %vm1194_vm1, %v1192_v38, %v1196_v39 }
 0x61e   :  { %v1199_v41 = vadd.f32 %v1197_v28, %v1721_v13  ;;  %v1200_v42 = vadd.f32 %v1198_v40, %v1719_v11 }
 0x620   :  { %v1201_v43 = vsel %vm234_vm4, %v1199_v41, -inf  ;;  %v1204_v44 = vsel %vm234_vm4, %v1200_v42, -inf }
 0x621   :  { %1202 = vmax.xlane.f32.xlu1 %v1201_v43  ;;  %1205 = vmax.xlane.f32.xlu0 %v1204_v44 }
 0x6ae   :  { %v1203_v45 = vpop.xlane.xlu1 %1202  ;;  %v1206_v46 = vpop.xlane.xlu0 %1205 }
 0x6af   :  { %v1207_v47 = vsub.f32 %v1199_v41, %v1203_v45  ;;  %v1208_v48 = vsub.f32 %v1200_v42, %v1206_v46 }
 0x6b1   :  { %v1209_v49 = vmul.f32 1.442695, %v1207_v47  ;;  %v1211_v50 = vmul.f32 1.442695, %v1208_v48 }
 0x6b3   :  { %1588 = vpow2.f32 %v1209_v49 }
 0x6b4   :  { %1590 = vpow2.f32 %v1211_v50 }
 0x6bd   :  { %v1589_v51 = vpop.eup %1588 }
 0x6be   :  { %v1591_v52 = vpop.eup %1590  ;;  %v1213_v13 = vsel %vm234_vm4, %v1589_v51, 0.0 }
 0x6bf   :  { %1214 = vadd.xlane.f32.xlu1 %v1213_v13  ;;  %v1216_v11 = vsel %vm234_vm4, %v1591_v52, 0.0 }
 0x6c0   :  { %1217 = vadd.xlane.f32.xlu0 %v1216_v11 }
 0x74c   :  { %v1215_v53 = vpop.xlane.xlu1 %1214 }
 0x74d   :  { %1592 = vrcp.f32 %v1215_v53  ;;  %v1218_v54 = vpop.xlane.xlu0 %1217 }
 0x74e   :  { %1594 = vrcp.f32 %v1218_v54 }
 0x757   :  { %v1593_v55 = vpop.eup %1592 }
 0x758   :  { %v1595_v56 = vpop.eup %1594  ;;  %v1221_v58 = vmul.f32 %v1593_v55, %v1589_v51 }
 0x759   :  { %v1222_v59 = vmul.f32 %v1595_v56, %v1591_v52 }
 0x75a   :  { %1478 = vmatprep.mubr.msk.f32.mxu0 %vm234_vm4, %v1221_v58 }
 0x75b   :  { %1479 = vmatmul.mubr.msk.f32.vlgmr.msra.gmra.mrb[10].mxu0 %vm234_vm4, %v1222_v59 }
 0x82e   :  { %v1480_v61 = vpop.f32.mrb[10].mxu0 }
 0x82f   :  { %v1308_v57 = vadd.f32 %v1480_v61, %v1366_v60  ;;  %v1302_v62 = vpop.f32.mrb[11].mxu0 }
 0x830   :  { %v1303_v12 = vadd.f32 %v1366_v60, %v1302_v62 }
 0x831   :  { %v1314_v63 = vsel %vm1161_vm15, %v1308_v57, -inf }
 0x832   :  { %1315 = vmax.xlane.f32.xlu0 %v1314_v63  ;;  %v1311_v0 = vsel %vm1161_vm15, %v1303_v12, -inf }
 0x833   :  { %1312 = vmax.xlane.f32.xlu1 %v1311_v0 }
 0x8bf   :  { %v1316_v1 = vpop.xlane.xlu0 %1315 }
 0x8c0   :  { %v1318_v2 = vsub.f32 %v1308_v57, %v1316_v1  ;;  %v1313_v3 = vpop.xlane.xlu1 %1312 }
 0x8c1   :  { %v1317_v4 = vsub.f32 %v1303_v12, %v1313_v3 }
 0x8c2   :  { %v1321_v5 = vmul.f32 1.442695, %v1318_v2 }
 0x8c3   :  { %v1319_v6 = vmul.f32 1.442695, %v1317_v4 }
 0x8c4   :  { %1596 = vpow2.f32 %v1321_v5 }
 0x8c5   :  { %1598 = vpow2.f32 %v1319_v6 }
 0x8ce   :  { %v1597_v7 = vpop.eup %1596 }
 0x8cf   :  { %v1599_v8 = vpop.eup %1598  ;;  %v1326_v9 = vsel %vm1161_vm15, %v1597_v7, 0.0 }
 0x8d0   :  { %1327 = vadd.xlane.f32.xlu0 %v1326_v9  ;;  %v1323_v10 = vsel %vm1161_vm15, %v1599_v8, 0.0 }
 0x8d1   :  { %1324 = vadd.xlane.f32.xlu1 %v1323_v10 }
 0x95d   :  { %v1328_v14 = vpop.xlane.xlu0 %1327 }
 0x95e   :  { %1600 = vlog2.f32 %v1328_v14  ;;  %v1325_v15 = vpop.xlane.xlu1 %1324 }
 0x95f   :  { %1602 = vlog2.f32 %v1325_v15 }
 0x968   :  { %v1601_v16 = vpop.eup %1600 }
 0x969   :  { %v1603_v17 = vpop.eup %1602  ;;  %v1332_v25 = vmul.f32 0.6931472, %v1601_v16 }
 0x96a   :  { %v1330_v18 = vmul.f32 0.6931472, %v1603_v17 }
 0x96b   :  { %v1334_v19 = vsub.f32 %v1318_v2, %v1332_v25 }
 0x96c   :  { %v1333_v20 = vsub.f32 %v1317_v4, %v1330_v18 }
 0x96d   :  { %1338 = vst.msk [vmem:[%s1855_s8 + $0x8] sm:$0xff] %vm1161_vm15, %v1334_v19 }
 0x96e   :  { %1337 = vst.msk [vmem:[%s1855_s8] sm:$0xff] %vm1161_vm15, %v1333_v20 }

</bundles_post_ra>
